<compile_context>
chip_gen: v7x
topology: tpu7x:2x2x1
jax: 0.10.0
libtpu: 0.0.40
codegen_flags: <defaults>
</compile_context>

<pallas_src>
import math
from functools import partial

import numpy as np
import jax
import jax.numpy as jnp
from jax.experimental import pallas as pl
from jax.experimental.pallas import tpu as pltpu  # noqa: F401

# ----------------------------- module "hyper-params" -----------------------------
PATCH = 2          # patch_size (stride of the depthwise conv)
K = 3              # dps_conv_k
PAD = K // 2
IN_CH = 8
OUT_CH = 32
WINDOW = 4         # window_size
B = 2
H_IN = 14
W_IN = 14


# ----------------------------- init-time constant folding -----------------------------
def build_patch_embed_consts(dw_w, dw_b, proj_w, H, W):
    """Fold ALL parameter-only math once at module-init time.

    Produces constants so the whole forward is
        out[b] = sum_ki  S[ki] @ x[b]  @ M[ki]  +  Bc
    with x[b] laid out as (H, W*C).

      S[ki]  (hn, H)     stride-2 output-row selection for conv tap-row ki,
                         including the k=3 zero halo (out-of-range rows dropped)
                         and window-pad rows left all-zero.
      M[ki]  (W*C, wn*O) stride-2 column / tap-kj selection fused with
                         dw_w[c,ki,kj] * proj_w[o,c]; window-pad cols all-zero.
      Bc     (hn, wn*O)  proj_w @ dw_b broadcast to valid tokens, zero at
                         window-pad tokens (relies on proj being bias-free).

    Constants depend only on (params, H, W) -- analogous to jit shape
    specialization -- and are batch-size independent.
    """
    dw_w = np.asarray(dw_w, np.float32)      # (C, 1, K, K)
    dw_b = np.asarray(dw_b, np.float32)      # (C,)
    proj_w = np.asarray(proj_w, np.float32)  # (O, C)
    C, O = dw_w.shape[0], proj_w.shape[0]

    ho = (H + 2 * PAD - K) // PATCH + 1
    wo = (W + 2 * PAD - K) // PATCH + 1
    hn = int(math.ceil(ho / WINDOW)) * WINDOW
    wn = int(math.ceil(wo / WINDOW)) * WINDOW

    S = np.zeros((K, hn, H), np.float32)
    for ki in range(K):
        for r in range(ho):                      # rows r >= ho stay all-zero (window pad)
            h = PATCH * r + ki - PAD
            if 0 <= h < H:
                S[ki, r, h] = 1.0

    M = np.zeros((K, W * C, wn * O), np.float32)
    for ki in range(K):
        for kj in range(K):
            blk = dw_w[:, 0, ki, kj][:, None] * proj_w.T        # (C, O)
            for q in range(wo):                  # cols q >= wo stay all-zero (window pad)
                w = PATCH * q + kj - PAD
                if 0 <= w < W:
                    M[ki, w * C:(w + 1) * C, q * O:(q + 1) * O] += blk

    Bc = np.zeros((hn, wn * O), np.float32)
    pb = proj_w @ dw_b                                           # (O,)
    for q in range(wo):
        Bc[:ho, q * O:(q + 1) * O] = pb

    return jnp.asarray(S), jnp.asarray(M), jnp.asarray(Bc)


# ----------------------------- Pallas kernel -----------------------------
def _patch_embed_kernel(x_ref, s_ref, m_ref, b_ref, o_ref):
    """x_ref (B,H,W*C) f32, s_ref (K,hn,H), m_ref (K,W*C,wn*O), b_ref (hn,wn*O)
       -> o_ref (B,hn,wn*O) f32.  Pure MXU matmuls + one VPU add per batch."""
    n_b = x_ref.shape[0]
    n_k = s_ref.shape[0]
    bias = b_ref[...]                         # (hn, wn*O), hoisted out of the loops
    for b in range(n_b):                      # tiny static unroll (B=2)
        xb = x_ref[b]                         # (H, W*C)
        acc = bias
        for ki in range(n_k):                 # static unroll over the 3 conv tap-rows
            rows = jnp.dot(s_ref[ki], xb, preferred_element_type=jnp.float32)      # (hn, W*C)
            acc = acc + jnp.dot(rows, m_ref[ki], preferred_element_type=jnp.float32)  # (hn, wn*O)
        o_ref[b] = acc


def patch_embed_call(x3, S, M, Bc):
    nb, hn = x3.shape[0], S.shape[1]
    wno = M.shape[-1]
    # No grid, no BlockSpecs: single invocation, whole arrays resident in VMEM
    # (~0.4 MiB total) -> no double buffering / pipeline prologue-epilogue.
    return pl.pallas_call(
        _patch_embed_kernel,
        out_shape=jax.ShapeDtypeStruct((nb, hn, wno), jnp.float32),
    )(x3, S, M, Bc)


# ----------------------------- forward (glue + kernel) -----------------------------
@partial(jax.jit, static_argnums=(1, 2))
def patch_embed_forward(x, H, W, consts, mask=None):
    """x: (B, H*W, C) -> (out (B, hn*wn, O), hn, wn, mask) — mirrors PatchEmbed.forward."""
    S, M, Bc = consts
    nb, _, c = x.shape
    ho = (H + 2 * PAD - K) // PATCH + 1
    wo = (W + 2 * PAD - K) // PATCH + 1
    hn = int(math.ceil(ho / WINDOW)) * WINDOW
    wn = int(math.ceil(wo / WINDOW)) * WINDOW
    o_ch = M.shape[-1] // wn

    # 'b (h w) c -> b h (w c)' : metadata-only reshape, no copy, no HBM round trip
    x3 = x.reshape(nb, H, W * c)
    out = patch_embed_call(x3, S, M, Bc)          # (B, hn, wn*O), lane-dense last dim
    out = out.reshape(nb, hn * wn, o_ch)          # free reshape

    # pad_tensor mask handling (tiny host-side glue, not part of the kernel)
    if mask is None:
        mask = jnp.zeros((1, 1, ho, wo), jnp.float32)
    mh, mw = mask.shape[-2], mask.shape[-1]
    if (mh, mw) != (ho, wo):
        # F.interpolate(mask, (ho, wo), mode='nearest'): src = floor(dst * in / out)
        ridx = (np.arange(ho) * mh) // ho
        cidx = (np.arange(wo) * mw) // wo
        mask = mask[:, :, ridx, :][:, :, :, cidx]
    mask = jnp.pad(mask, ((0, 0), (0, 0), (0, hn - ho), (0, wn - wo)),
                   constant_values=1.0)
    return out, hn, wn, mask


# ----------------------------- main -----------------------------
if __name__ == "__main__":
    key = jax.random.PRNGKey(0)
    k1, k2, k3, k4 = jax.random.split(key, 4)

    # deterministic synthetic parameters (shapes from the module's __init__)
    dw_w = 0.1 * jax.random.normal(k1, (IN_CH, 1, K, K), jnp.float32)   # Conv2d weight (groups=in_ch)
    dw_b = 0.1 * jax.random.normal(k2, (IN_CH,), jnp.float32)           # Conv2d bias
    proj_w = 0.1 * jax.random.normal(k3, (OUT_CH, IN_CH), jnp.float32)  # Linear weight (out, in)

    x = jax.random.normal(k4, (B, H_IN * W_IN, IN_CH), jnp.float32)

    # "module init": fold the parameters ONCE (not in the per-call path)
    consts = build_patch_embed_consts(dw_w, dw_b, proj_w, H_IN, W_IN)

    out, Hn, Wn, mask = patch_embed_forward(x, H_IN, W_IN, consts)
    out = jax.block_until_ready(out)
    mask = jax.block_until_ready(mask)
    Hn, Wn = int(Hn), int(Wn)

    # pure-JAX f32 reference (same math as the PyTorch module) for a sanity check
    x_img = x.reshape(B, H_IN, W_IN, IN_CH).transpose(0, 3, 1, 2)
    ref_conv = jax.lax.conv_general_dilated(
        x_img, dw_w, window_strides=(PATCH, PATCH),
        padding=((PAD, PAD), (PAD, PAD)),
        dimension_numbers=("NCHW", "OIHW", "NCHW"),
        feature_group_count=IN_CH,
        precision=jax.lax.Precision.HIGHEST,
    ) + dw_b[None, :, None, None]
    Ho, Wo = ref_conv.shape[2], ref_conv.shape[3]
    pad_r = int(math.ceil(Wo / WINDOW)) * WINDOW - Wo
    pad_b = int(math.ceil(Ho / WINDOW)) * WINDOW - Ho
    ref_img = jnp.pad(ref_conv, ((0, 0), (0, 0), (0, pad_b), (0, pad_r)))
    ref_seq = ref_img.transpose(0, 2, 3, 1).reshape(B, (Ho + pad_b) * (Wo + pad_r), IN_CH)
    ref_out = jnp.einsum("blc,oc->blo", ref_seq, proj_w,
                         precision=jax.lax.Precision.HIGHEST)

    assert out.shape == (B, Hn * Wn, OUT_CH), out.shape
    assert mask.shape == (1, 1, Hn, Wn), mask.shape
    err = float(jnp.max(jnp.abs(out - ref_out)))
    assert err < 1e-2, err

    print("KERNEL_OK")
</pallas_src>

<mosaic_0001>
module attributes {stable_mosaic.version = 11 : i64} {
  func.func @_patch_embed_kernel(%arg0: memref<2x14x112xf32, #tpu.memory_space<vmem>>, %arg1: memref<3x8x14xf32, #tpu.memory_space<vmem>>, %arg2: memref<3x112x256xf32, #tpu.memory_space<vmem>>, %arg3: memref<8x256xf32, #tpu.memory_space<vmem>>, %arg4: memref<2x8x256xf32, #tpu.memory_space<vmem>>) attributes {dimension_semantics = [], scalar_prefetch = 0 : i64, scratch_operands = 0 : i64, tpu.core_type = #tpu.core_type<tc>} {
    %c0 = arith.constant 0 : index
    %c0_0 = arith.constant 0 : index
    %0 = vector.load %arg3[%c0, %c0_0] : memref<8x256xf32, #tpu.memory_space<vmem>>, vector<8x256xf32>
    %c0_1 = arith.constant 0 : index
    %c0_2 = arith.constant 0 : index
    %c0_3 = arith.constant 0 : index
    %1 = vector.load %arg0[%c0_1, %c0_2, %c0_3] : memref<2x14x112xf32, #tpu.memory_space<vmem>>, vector<1x14x112xf32>
    %2 = vector.shape_cast %1 : vector<1x14x112xf32> to vector<14x112xf32>
    %c0_4 = arith.constant 0 : index
    %c0_5 = arith.constant 0 : index
    %c0_6 = arith.constant 0 : index
    %3 = vector.load %arg1[%c0_4, %c0_5, %c0_6] : memref<3x8x14xf32, #tpu.memory_space<vmem>>, vector<1x8x14xf32>
    %4 = vector.shape_cast %3 : vector<1x8x14xf32> to vector<8x14xf32>
    %cst = arith.constant dense<0.000000e+00> : vector<8x112xf32>
    %5 = tpu.matmul %4, %2, %cst {dimension_numbers = #tpu.dot_dimension_numbers<[1], [0], [0], [1], [0, 0, 1, 1], [], []>} : vector<8x14xf32>, vector<14x112xf32>, vector<8x112xf32> -> vector<8x112xf32>
    %c0_7 = arith.constant 0 : index
    %c0_8 = arith.constant 0 : index
    %c0_9 = arith.constant 0 : index
    %6 = vector.load %arg2[%c0_7, %c0_8, %c0_9] : memref<3x112x256xf32, #tpu.memory_space<vmem>>, vector<1x112x256xf32>
    %7 = vector.shape_cast %6 : vector<1x112x256xf32> to vector<112x256xf32>
    %cst_10 = arith.constant dense<0.000000e+00> : vector<8x256xf32>
    %8 = tpu.matmul %5, %7, %cst_10 {dimension_numbers = #tpu.dot_dimension_numbers<[1], [0], [0], [1], [0, 0, 1, 1], [], []>} : vector<8x112xf32>, vector<112x256xf32>, vector<8x256xf32> -> vector<8x256xf32>
    %9 = arith.addf %0, %8 : vector<8x256xf32>
    %c1 = arith.constant 1 : index
    %c0_11 = arith.constant 0 : index
    %c0_12 = arith.constant 0 : index
    %10 = vector.load %arg1[%c1, %c0_11, %c0_12] : memref<3x8x14xf32, #tpu.memory_space<vmem>>, vector<1x8x14xf32>
    %11 = vector.shape_cast %10 : vector<1x8x14xf32> to vector<8x14xf32>
    %cst_13 = arith.constant dense<0.000000e+00> : vector<8x112xf32>
    %12 = tpu.matmul %11, %2, %cst_13 {dimension_numbers = #tpu.dot_dimension_numbers<[1], [0], [0], [1], [0, 0, 1, 1], [], []>} : vector<8x14xf32>, vector<14x112xf32>, vector<8x112xf32> -> vector<8x112xf32>
    %c1_14 = arith.constant 1 : index
    %c0_15 = arith.constant 0 : index
    %c0_16 = arith.constant 0 : index
    %13 = vector.load %arg2[%c1_14, %c0_15, %c0_16] : memref<3x112x256xf32, #tpu.memory_space<vmem>>, vector<1x112x256xf32>
    %14 = vector.shape_cast %13 : vector<1x112x256xf32> to vector<112x256xf32>
    %cst_17 = arith.constant dense<0.000000e+00> : vector<8x256xf32>
    %15 = tpu.matmul %12, %14, %cst_17 {dimension_numbers = #tpu.dot_dimension_numbers<[1], [0], [0], [1], [0, 0, 1, 1], [], []>} : vector<8x112xf32>, vector<112x256xf32>, vector<8x256xf32> -> vector<8x256xf32>
    %16 = arith.addf %9, %15 : vector<8x256xf32>
    %c2 = arith.constant 2 : index
    %c0_18 = arith.constant 0 : index
    %c0_19 = arith.constant 0 : index
    %17 = vector.load %arg1[%c2, %c0_18, %c0_19] : memref<3x8x14xf32, #tpu.memory_space<vmem>>, vector<1x8x14xf32>
    %18 = vector.shape_cast %17 : vector<1x8x14xf32> to vector<8x14xf32>
    %cst_20 = arith.constant dense<0.000000e+00> : vector<8x112xf32>
    %19 = tpu.matmul %18, %2, %cst_20 {dimension_numbers = #tpu.dot_dimension_numbers<[1], [0], [0], [1], [0, 0, 1, 1], [], []>} : vector<8x14xf32>, vector<14x112xf32>, vector<8x112xf32> -> vector<8x112xf32>
    %c2_21 = arith.constant 2 : index
    %c0_22 = arith.constant 0 : index
    %c0_23 = arith.constant 0 : index
    %20 = vector.load %arg2[%c2_21, %c0_22, %c0_23] : memref<3x112x256xf32, #tpu.memory_space<vmem>>, vector<1x112x256xf32>
    %21 = vector.shape_cast %20 : vector<1x112x256xf32> to vector<112x256xf32>
    %cst_24 = arith.constant dense<0.000000e+00> : vector<8x256xf32>
    %22 = tpu.matmul %19, %21, %cst_24 {dimension_numbers = #tpu.dot_dimension_numbers<[1], [0], [0], [1], [0, 0, 1, 1], [], []>} : vector<8x112xf32>, vector<112x256xf32>, vector<8x256xf32> -> vector<8x256xf32>
    %23 = arith.addf %16, %22 : vector<8x256xf32>
    %c0_25 = arith.constant 0 : index
    %c0_26 = arith.constant 0 : index
    %c0_27 = arith.constant 0 : index
    %24 = vector.load %arg4[%c0_25, %c0_26, %c0_27] : memref<2x8x256xf32, #tpu.memory_space<vmem>>, vector<1x8x256xf32>
    %25 = vector.shape_cast %24 : vector<1x8x256xf32> to vector<8x256xf32>
    %26 = vector.shape_cast %23 : vector<8x256xf32> to vector<1x8x256xf32>
    tpu.vector_store %arg4[%c0_25, %c0_26, %c0_27], %26 {strides = array<i32>} : memref<2x8x256xf32, #tpu.memory_space<vmem>>, vector<1x8x256xf32>,
    %c1_28 = arith.constant 1 : index
    %c0_29 = arith.constant 0 : index
    %c0_30 = arith.constant 0 : index
    %27 = vector.load %arg0[%c1_28, %c0_29, %c0_30] : memref<2x14x112xf32, #tpu.memory_space<vmem>>, vector<1x14x112xf32>
    %28 = vector.shape_cast %27 : vector<1x14x112xf32> to vector<14x112xf32>
    %c0_31 = arith.constant 0 : index
    %c0_32 = arith.constant 0 : index
    %c0_33 = arith.constant 0 : index
    %29 = vector.load %arg1[%c0_31, %c0_32, %c0_33] : memref<3x8x14xf32, #tpu.memory_space<vmem>>, vector<1x8x14xf32>
    %30 = vector.shape_cast %29 : vector<1x8x14xf32> to vector<8x14xf32>
    %cst_34 = arith.constant dense<0.000000e+00> : vector<8x112xf32>
    %31 = tpu.matmul %30, %28, %cst_34 {dimension_numbers = #tpu.dot_dimension_numbers<[1], [0], [0], [1], [0, 0, 1, 1], [], []>} : vector<8x14xf32>, vector<14x112xf32>, vector<8x112xf32> -> vector<8x112xf32>
    %c0_35 = arith.constant 0 : index
    %c0_36 = arith.constant 0 : index
    %c0_37 = arith.constant 0 : index
    %32 = vector.load %arg2[%c0_35, %c0_36, %c0_37] : memref<3x112x256xf32, #tpu.memory_space<vmem>>, vector<1x112x256xf32>
    %33 = vector.shape_cast %32 : vector<1x112x256xf32> to vector<112x256xf32>
    %cst_38 = arith.constant dense<0.000000e+00> : vector<8x256xf32>
    %34 = tpu.matmul %31, %33, %cst_38 {dimension_numbers = #tpu.dot_dimension_numbers<[1], [0], [0], [1], [0, 0, 1, 1], [], []>} : vector<8x112xf32>, vector<112x256xf32>, vector<8x256xf32> -> vector<8x256xf32>
    %35 = arith.addf %0, %34 : vector<8x256xf32>
    %c1_39 = arith.constant 1 : index
    %c0_40 = arith.constant 0 : index
    %c0_41 = arith.constant 0 : index
    %36 = vector.load %arg1[%c1_39, %c0_40, %c0_41] : memref<3x8x14xf32, #tpu.memory_space<vmem>>, vector<1x8x14xf32>
    %37 = vector.shape_cast %36 : vector<1x8x14xf32> to vector<8x14xf32>
    %cst_42 = arith.constant dense<0.000000e+00> : vector<8x112xf32>
    %38 = tpu.matmul %37, %28, %cst_42 {dimension_numbers = #tpu.dot_dimension_numbers<[1], [0], [0], [1], [0, 0, 1, 1], [], []>} : vector<8x14xf32>, vector<14x112xf32>, vector<8x112xf32> -> vector<8x112xf32>
    %c1_43 = arith.constant 1 : index
    %c0_44 = arith.constant 0 : index
    %c0_45 = arith.constant 0 : index
    %39 = vector.load %arg2[%c1_43, %c0_44, %c0_45] : memref<3x112x256xf32, #tpu.memory_space<vmem>>, vector<1x112x256xf32>
    %40 = vector.shape_cast %39 : vector<1x112x256xf32> to vector<112x256xf32>
    %cst_46 = arith.constant dense<0.000000e+00> : vector<8x256xf32>
    %41 = tpu.matmul %38, %40, %cst_46 {dimension_numbers = #tpu.dot_dimension_numbers<[1], [0], [0], [1], [0, 0, 1, 1], [], []>} : vector<8x112xf32>, vector<112x256xf32>, vector<8x256xf32> -> vector<8x256xf32>
    %42 = arith.addf %35, %41 : vector<8x256xf32>
    %c2_47 = arith.constant 2 : index
    %c0_48 = arith.constant 0 : index
    %c0_49 = arith.constant 0 : index
    %43 = vector.load %arg1[%c2_47, %c0_48, %c0_49] : memref<3x8x14xf32, #tpu.memory_space<vmem>>, vector<1x8x14xf32>
    %44 = vector.shape_cast %43 : vector<1x8x14xf32> to vector<8x14xf32>
    %cst_50 = arith.constant dense<0.000000e+00> : vector<8x112xf32>
    %45 = tpu.matmul %44, %28, %cst_50 {dimension_numbers = #tpu.dot_dimension_numbers<[1], [0], [0], [1], [0, 0, 1, 1], [], []>} : vector<8x14xf32>, vector<14x112xf32>, vector<8x112xf32> -> vector<8x112xf32>
    %c2_51 = arith.constant 2 : index
    %c0_52 = arith.constant 0 : index
    %c0_53 = arith.constant 0 : index
    %46 = vector.load %arg2[%c2_51, %c0_52, %c0_53] : memref<3x112x256xf32, #tpu.memory_space<vmem>>, vector<1x112x256xf32>
    %47 = vector.shape_cast %46 : vector<1x112x256xf32> to vector<112x256xf32>
    %cst_54 = arith.constant dense<0.000000e+00> : vector<8x256xf32>
    %48 = tpu.matmul %45, %47, %cst_54 {dimension_numbers = #tpu.dot_dimension_numbers<[1], [0], [0], [1], [0, 0, 1, 1], [], []>} : vector<8x112xf32>, vector<112x256xf32>, vector<8x256xf32> -> vector<8x256xf32>
    %49 = arith.addf %42, %48 : vector<8x256xf32>
    %c1_55 = arith.constant 1 : index
    %c0_56 = arith.constant 0 : index
    %c0_57 = arith.constant 0 : index
    %50 = vector.load %arg4[%c1_55, %c0_56, %c0_57] : memref<2x8x256xf32, #tpu.memory_space<vmem>>, vector<1x8x256xf32>
    %51 = vector.shape_cast %50 : vector<1x8x256xf32> to vector<8x256xf32>
    %52 = vector.shape_cast %49 : vector<8x256xf32> to vector<1x8x256xf32>
    tpu.vector_store %arg4[%c1_55, %c0_56, %c0_57], %52 {strides = array<i32>} : memref<2x8x256xf32, #tpu.memory_space<vmem>>, vector<1x8x256xf32>,
    return
  }
}

</mosaic_0001>

<bundles_post_ra>
// kernel: patch_embed_forward.1
= control target key start
LH: loop header
LB: loop body
LE: loop exit
PB: predicated region body
PF: predicated region fallthrough
CT: control target
= control target key end

     0   :  { %vm26_vm0 = vcmask 1045504   ;;  %v1520_v0 = vmov 0.0|0.0   ;;  %vm1521_vm1 = vmmov 1   ;;  %vm1522_vm3 = vmmov 0   ;;  %s1902_s0 = inlined_call_operand.vmem [shape: f32[2,14,112], index: 0, kind: input, shape index: {}]   ;;  %s1903_s1 = inlined_call_operand.vmem [shape: f32[3,8,14], index: 1, kind: input, shape index: {}]   ;;  %s1904_s2 = inlined_call_operand.vmem [shape: f32[3,112,256], index: 2, kind: input, shape index: {}]   ;;  %s1905_s3 = inlined_call_operand.vmem [shape: f32[8,256], index: 3, kind: input, shape index: {}]   ;;  %s1906_s4 = inlined_call_operand.vmem [shape: f32[2,8,256], index: 4, kind: output, shape index: {}]  }
   0x1   :  { %1312 = vmatprep.subr.bf16.mxu1 %v1520_v0  ;;  %1408 = vmatprep.subr.bf16.mxu0 %v1520_v0  ;;  %v19_v1 = vld [vmem:[%s1902_s0] sm:$0xff]  ;;  %v20_v2 = vld [vmem:[%s1902_s0 + $0x8] sm:$0x3f]  ;;  %vm1557_vm2 = vmpackc.low %vm26_vm0, %vm1521_vm1  ;;  %v1523_v7 = vmov 0.0   ;;  %vm22_vm4 = vcmask 113664   ;;  %vm128_vm5 = vcmask 916480  }
   0x2   :  { %v1561_v4 = vpack.c.bf16 %v20_v2, %v19_v1  ;;  %v1181_v5 = vld [vmem:[%s1902_s0 + $0x10] sm:$0xff]  ;;  %v1182_v6 = vld [vmem:[%s1902_s0 + $0x18] sm:$0x3f]  ;;  %1274 = vmatprep.mubr.msk.f32.mxu1 %vm1522_vm3, %v1523_v7  ;;  %1295 = vmatprep.mubr.msk.f32.mxu0 %vm1522_vm3, %v1523_v7  ;;  %v21_v8 = vld [vmem:[%s1903_s1] sm:$0xff] }
   0x3   :  { %v1576_v9 = vpack.c.bf16 %v1182_v6, %v1181_v5  ;;  %v101_v10 = vld [vmem:[%s1904_s2 + $0x8] sm:$0xff]  ;;  %v103_v11 = vld [vmem:[%s1904_s2 + $0x18] sm:$0xff]  ;;  %v100_v12 = vld [vmem:[%s1904_s2] sm:$0xff] }
   0x4   :  { %1315 = vmatpush3.bf16.msk.msra.mxu1 %vm1557_vm2, %v1561_v4  ;;  %v1316_v13 = vpack.c.bf16 %v103_v11, %v101_v10  ;;  %v102_v14 = vld [vmem:[%s1904_s2 + $0x10] sm:$0xff]  ;;  %v105_v15 = vld [vmem:[%s1904_s2 + $0x28] sm:$0xff]  ;;  %v107_v16 = vld [vmem:[%s1904_s2 + $0x38] sm:$0xff] }
   0x5   :  { %1411 = vmatpush3.bf16.msk.msra.mxu0 %vm1557_vm2, %v1576_v9  ;;  %v1318_v17 = vpack.c.bf16 %v102_v14, %v100_v12  ;;  %v1320_v18 = vpack.c.bf16 %v107_v16, %v105_v15  ;;  %v104_v19 = vld [vmem:[%s1904_s2 + $0x20] sm:$0xff]  ;;  %v106_v20 = vld [vmem:[%s1904_s2 + $0x30] sm:$0xff]  ;;  %v109_v21 = vld [vmem:[%s1904_s2 + $0x48] sm:$0xff] }
   0x6   :  { %1317 = vmatprep.subr.bf16.mxu1 %v1316_v13  ;;  %1413 = vmatprep.subr.bf16.mxu0 %v1316_v13  ;;  %v111_v22 = vld [vmem:[%s1904_s2 + $0x58] sm:$0xff]  ;;  %v1322_v23 = vpack.c.bf16 %v106_v20, %v104_v19  ;;  %v108_v25 = vld [vmem:[%s1904_s2 + $0x40] sm:$0xff]  ;;  %v110_v26 = vld [vmem:[%s1904_s2 + $0x50] sm:$0xff] }
   0x7   :  { %1275 = vmatmul.mubr.msk.f32.vlgmr.msra.gmra.mrb[0].mxu1 %vm22_vm4, %v21_v8  ;;  %v1324_v24 = vpack.c.bf16 %v111_v22, %v109_v21  ;;  %v113_v27 = vld [vmem:[%s1904_s2 + $0x68] sm:$0xff]  ;;  %v115_v28 = vld [vmem:[%s1904_s2 + $0x78] sm:$0xff]  ;;  %v1326_v29 = vpack.c.bf16 %v110_v26, %v108_v25  ;;  %v112_v31 = vld [vmem:[%s1904_s2 + $0x60] sm:$0xff] }
   0x8   :  { %1296 = vmatmul.mubr.msk.f32.vlgmr.msra.gmra.mrb[0].mxu0 %vm22_vm4, %v21_v8  ;;  %1319 = vmatpush1.bf16.msra.mxu1 %v1318_v17  ;;  %v1328_v30 = vpack.c.bf16 %v115_v28, %v113_v27  ;;  %v114_v32 = vld [vmem:[%s1904_s2 + $0x70] sm:$0xff]  ;;  %v117_v33 = vld [vmem:[%s1904_s2 + $0x88] sm:$0xff]  ;;  %v119_v34 = vld [vmem:[%s1904_s2 + $0x98] sm:$0xff] }
   0x9   :  { %1415 = vmatpush1.bf16.msra.mxu0 %v1318_v17  ;;  %1321 = vmatprep.subr.bf16.mxu1 %v1320_v18  ;;  %v1330_v35 = vpack.c.bf16 %v114_v32, %v112_v31  ;;  %v1332_v36 = vpack.c.bf16 %v119_v34, %v117_v33  ;;  %v116_v37 = vld [vmem:[%s1904_s2 + $0x80] sm:$0xff]  ;;  %v118_v38 = vld [vmem:[%s1904_s2 + $0x90] sm:$0xff]  ;;  %v121_v39 = vld [vmem:[%s1904_s2 + $0xa8] sm:$0xff] }
   0xa   :  { %1417 = vmatprep.subr.bf16.mxu0 %v1320_v18  ;;  %196 = vmatprep.mubr.f32.mxu1 %v1523_v7  ;;  %v123_v40 = vld [vmem:[%s1904_s2 + $0xb8] sm:$0xff]  ;;  %v1334_v41 = vpack.c.bf16 %v118_v38, %v116_v37  ;;  %v120_v43 = vld [vmem:[%s1904_s2 + $0xa0] sm:$0xff]  ;;  %v122_v44 = vld [vmem:[%s1904_s2 + $0xb0] sm:$0xff] }
   0xb   :  { %742 = vmatprep.mubr.f32.mxu0 %v1523_v7  ;;  %v1336_v42 = vpack.c.bf16 %v123_v40, %v121_v39  ;;  %v125_v45 = vld [vmem:[%s1904_s2 + $0xc8] sm:$0xff]  ;;  %v127_v46 = vld [vmem:[%s1904_s2 + $0xd8] sm:$0xff]  ;;  %v1338_v47 = vpack.c.bf16 %v122_v44, %v120_v43  ;;  %v124_v49 = vld [vmem:[%s1904_s2 + $0xc0] sm:$0xff] }
   0xc   :  { %1323 = vmatpush1.bf16.msra.mxu1 %v1322_v23  ;;  %v1340_v48 = vpack.c.bf16 %v127_v46, %v125_v45  ;;  %v126_v50 = vld [vmem:[%s1904_s2 + $0xd0] sm:$0xff]  ;;  %v1121_v52 = vld [vmem:[%s1904_s2 + $0xe8] sm:$0xff]  ;;  %v1123_v53 = vld [vmem:[%s1904_s2 + $0xf8] sm:$0xff] }
   0xd   :  { %1419 = vmatpush1.bf16.msra.mxu0 %v1322_v23  ;;  %1325 = vmatprep.subr.bf16.mxu1 %v1324_v24  ;;  %v1342_v51 = vpack.c.bf16 %v126_v50, %v124_v49  ;;  %v1120_v54 = vld [vmem:[%s1904_s2 + $0xe0] sm:$0xff]  ;;  %v1122_v55 = vld [vmem:[%s1904_s2 + $0xf0] sm:$0xff]  ;;  %v1348_v57 = vpack.c.bf16 %v1123_v53, %v1121_v52  ;;  %v1125_v58 = vld [vmem:[%s1904_s2 + $0x108] sm:$0xff] }
   0xe   :  { %1421 = vmatprep.subr.bf16.mxu0 %v1324_v24  ;;  %v1127_v59 = vld [vmem:[%s1904_s2 + $0x118] sm:$0xff]  ;;  %v1117_v63 = vld [vmem:[%s1903_s1 + $0x8] sm:$0xff]  ;;  %v1350_v1 = vpack.c.bf16 %v1122_v55, %v1120_v54  ;;  %v1124_v5 = vld [vmem:[%s1904_s2 + $0x100] sm:$0xff] }
   0xf   :  { %v1352_v2 = vpack.c.bf16 %v1127_v59, %v1125_v58  ;;  %v1126_v6 = vld [vmem:[%s1904_s2 + $0x110] sm:$0xff]  ;;  %v1129_v8 = vld [vmem:[%s1904_s2 + $0x128] sm:$0xff]  ;;  %v1131_v10 = vld [vmem:[%s1904_s2 + $0x138] sm:$0xff] }
  0x10   :  { %1327 = vmatpush1.bf16.msra.mxu1 %v1326_v29  ;;  %v1354_v11 = vpack.c.bf16 %v1126_v6, %v1124_v5  ;;  %v1356_v12 = vpack.c.bf16 %v1131_v10, %v1129_v8  ;;  %v1128_v13 = vld [vmem:[%s1904_s2 + $0x120] sm:$0xff]  ;;  %v1130_v14 = vld [vmem:[%s1904_s2 + $0x130] sm:$0xff]  ;;  %v1133_v15 = vld [vmem:[%s1904_s2 + $0x148] sm:$0xff] }
  0x11   :  { %1423 = vmatpush1.bf16.msra.mxu0 %v1326_v29  ;;  %1329 = vmatprep.subr.bf16.mxu1 %v1328_v30  ;;  %v1135_v16 = vld [vmem:[%s1904_s2 + $0x158] sm:$0xff]  ;;  %v1358_v17 = vpack.c.bf16 %v1130_v14, %v1128_v13  ;;  %v1132_v19 = vld [vmem:[%s1904_s2 + $0x140] sm:$0xff]  ;;  %v1134_v20 = vld [vmem:[%s1904_s2 + $0x150] sm:$0xff] }
  0x12   :  { %1425 = vmatprep.subr.bf16.mxu0 %v1328_v30  ;;  %v1360_v18 = vpack.c.bf16 %v1135_v16, %v1133_v15  ;;  %v1137_v21 = vld [vmem:[%s1904_s2 + $0x168] sm:$0xff]  ;;  %v1139_v22 = vld [vmem:[%s1904_s2 + $0x178] sm:$0xff]  ;;  %v1362_v23 = vpack.c.bf16 %v1134_v20, %v1132_v19  ;;  %v1136_v25 = vld [vmem:[%s1904_s2 + $0x160] sm:$0xff] }
  0x13   :  { %v1364_v24 = vpack.c.bf16 %v1139_v22, %v1137_v21  ;;  %v1138_v26 = vld [vmem:[%s1904_s2 + $0x170] sm:$0xff]  ;;  %v1141_v27 = vld [vmem:[%s1904_s2 + $0x188] sm:$0xff]  ;;  %v1143_v28 = vld [vmem:[%s1904_s2 + $0x198] sm:$0xff] }
  0x14   :  { %1331 = vmatpush1.bf16.msra.mxu1 %v1330_v35  ;;  %v1366_v29 = vpack.c.bf16 %v1138_v26, %v1136_v25  ;;  %v1368_v30 = vpack.c.bf16 %v1143_v28, %v1141_v27  ;;  %v1140_v31 = vld [vmem:[%s1904_s2 + $0x180] sm:$0xff]  ;;  %v1142_v32 = vld [vmem:[%s1904_s2 + $0x190] sm:$0xff]  ;;  %v1145_v33 = vld [vmem:[%s1904_s2 + $0x1a8] sm:$0xff] }
  0x15   :  { %1427 = vmatpush1.bf16.msra.mxu0 %v1330_v35  ;;  %1333 = vmatprep.subr.bf16.mxu1 %v1332_v36  ;;  %v1147_v34 = vld [vmem:[%s1904_s2 + $0x1b8] sm:$0xff]  ;;  %v1370_v35 = vpack.c.bf16 %v1142_v32, %v1140_v31  ;;  %v1144_v37 = vld [vmem:[%s1904_s2 + $0x1a0] sm:$0xff]  ;;  %v1146_v38 = vld [vmem:[%s1904_s2 + $0x1b0] sm:$0xff] }
  0x16   :  { %1429 = vmatprep.subr.bf16.mxu0 %v1332_v36  ;;  %v1372_v36 = vpack.c.bf16 %v1147_v34, %v1145_v33  ;;  %v1374_v39 = vpack.c.bf16 %v1146_v38, %v1144_v37  ;;  %v1153_v40 = vld [vmem:[%s1904_s2 + $0x1c8] sm:$0xff]  ;;  %v1154_v43 = vld [vmem:[%s1904_s2 + $0x1d0] sm:$0xff]  ;;  %v1159_v46 = vld [vmem:[%s1904_s2 + $0x1f8] sm:$0xff] }
  0x17   :  { %v1149_v50 = vld [vmem:[%s1903_s1 + $0x10] sm:$0xff]  ;;  %v1161_v3 = vld [vmem:[%s1904_s2 + $0x208] sm:$0xff]  ;;  %v1167_v59 = vld [vmem:[%s1904_s2 + $0x238] sm:$0xff] }
  0x18   :  { %1335 = vmatpush1.bf16.msra.mxu1 %v1334_v41  ;;  %v1158_v53 = vld [vmem:[%s1904_s2 + $0x1f0] sm:$0xff]  ;;  %v1165_v58 = vld [vmem:[%s1904_s2 + $0x228] sm:$0xff]  ;;  %v1168_v6 = vld [vmem:[%s1904_s2 + $0x240] sm:$0xff] }
  0x19   :  { %1431 = vmatpush1.bf16.msra.mxu0 %v1334_v41  ;;  %1337 = vmatprep.subr.bf16.mxu1 %v1336_v42  ;;  %v1155_v41 = vld [vmem:[%s1904_s2 + $0x1d8] sm:$0xff]  ;;  %v1170_v8 = vld [vmem:[%s1904_s2 + $0x250] sm:$0xff]  ;;  %v1173_v10 = vld [vmem:[%s1904_s2 + $0x268] sm:$0xff] }
  0x1a   :  { %1433 = vmatprep.subr.bf16.mxu0 %v1336_v42  ;;  %v1152_v42 = vld [vmem:[%s1904_s2 + $0x1c0] sm:$0xff]  ;;  %v1380_v45 = vpack.c.bf16 %v1155_v41, %v1153_v40  ;;  %v1174_v15 = vld [vmem:[%s1904_s2 + $0x270] sm:$0xff]  ;;  %v1177_v16 = vld [vmem:[%s1904_s2 + $0x288] sm:$0xff] }
  0x1b   :  { %v1172_v14 = vld [vmem:[%s1904_s2 + $0x260] sm:$0xff]  ;;  %v1178_v21 = vld [vmem:[%s1904_s2 + $0x290] sm:$0xff]  ;;  %v18_v28 = vld [vmem:[%s1905_s3 + $0x8] sm:$0xff] }
  0x1c   :  { %1339 = vmatpush1.bf16.msra.mxu1 %v1338_v47  ;;  %v1176_v20 = vld [vmem:[%s1904_s2 + $0x280] sm:$0xff] }
  0x1d   :  { %1435 = vmatpush1.bf16.msra.mxu0 %v1338_v47  ;;  %1341 = vmatprep.subr.bf16.mxu1 %v1340_v48  ;;  %v1406_v22 = vpack.c.bf16 %v1178_v21, %v1176_v20  ;;  %v17_v27 = vld [vmem:[%s1905_s3] sm:$0xff] }
  0x1e   :  { %1437 = vmatprep.subr.bf16.mxu0 %v1340_v48 }
  0x20   :  { %1343 = vmatpush1.bf16.msra.mxu1 %v1342_v51 }
  0x21   :  { %1439 = vmatpush1.bf16.msra.mxu0 %v1342_v51  ;;  %1344 = vmatprep.subr.bf16.mxu1 %v1520_v0  ;;  %v1382_v51 = vpack.c.bf16 %v1154_v43, %v1152_v42 }
  0x22   :  { %1440 = vmatprep.subr.bf16.mxu0 %v1520_v0 }
  0xda   :  { %v96_v56 = vpop.f32.mrb[0].mxu1 }
  0xdb   :  { %v643_v60 = vpop.f32.mrb[0].mxu0  ;;  %v1276_v61 = vpop.f32.mrb[1].mxu1  ;;  %1116 = vmatmul.mubr.msk.f32.vlgmr.msra.gmra.mrb[2].mxu1 %vm128_vm5, %v96_v56  ;;  %v1160_v56 = vld [vmem:[%s1904_s2 + $0x200] sm:$0xff] }
  0xdc   :  { %1347 = vmatpush3.bf16.msk.msra.mxu1 %vm1557_vm2, %v1561_v4  ;;  %v1297_v62 = vpop.f32.mrb[1].mxu0  ;;  %1185 = vmatmul.mubr.msk.f32.vlgmr.msra.gmra.mrb[2].mxu0 %vm128_vm5, %v643_v60  ;;  %v1392_v61 = vpack.c.bf16 %v1167_v59, %v1165_v58 }
  0xdd   :  { %1443 = vmatpush3.bf16.msk.msra.mxu0 %vm1557_vm2, %v1576_v9  ;;  %1281 = vmatprep.mubr.msk.f32.mxu1 %vm1522_vm3, %v1523_v7  ;;  %v1164_v62 = vld [vmem:[%s1904_s2 + $0x220] sm:$0xff] }
  0xde   :  { %1302 = vmatprep.mubr.msk.f32.mxu0 %vm1522_vm3, %v1523_v7  ;;  %1349 = vmatprep.subr.bf16.mxu1 %v1348_v57 }
  0xdf   :  { %1282 = vmatmul.mubr.msk.f32.vlgmr.msra.gmra.mrb[4].mxu1 %vm22_vm4, %v1117_v63  ;;  %1445 = vmatprep.subr.bf16.mxu0 %v1348_v57  ;;  %v1162_v57 = vld [vmem:[%s1904_s2 + $0x210] sm:$0xff] }
  0xe0   :  { %1303 = vmatmul.mubr.msk.f32.vlgmr.msra.gmra.mrb[4].mxu0 %vm22_vm4, %v1117_v63  ;;  %1351 = vmatpush1.bf16.msra.mxu1 %v1350_v1  ;;  %v1390_v60 = vpack.c.bf16 %v1162_v57, %v1160_v56  ;;  %v1166_v63 = vld [vmem:[%s1904_s2 + $0x230] sm:$0xff] }
  0xe1   :  { %1447 = vmatpush1.bf16.msra.mxu0 %v1350_v1  ;;  %1353 = vmatprep.subr.bf16.mxu1 %v1352_v2  ;;  %v1169_v1 = vld [vmem:[%s1904_s2 + $0x248] sm:$0xff] }
  0xe2   :  { %1449 = vmatprep.subr.bf16.mxu0 %v1352_v2  ;;  %376 = vmatprep.mubr.f32.mxu1 %v1523_v7  ;;  %v1394_v2 = vpack.c.bf16 %v1166_v63, %v1164_v62 }
  0xe3   :  { %920 = vmatprep.mubr.f32.mxu0 %v1523_v7 }
  0xe4   :  { %1355 = vmatpush1.bf16.msra.mxu1 %v1354_v11 }
  0xe5   :  { %1451 = vmatpush1.bf16.msra.mxu0 %v1354_v11  ;;  %1357 = vmatprep.subr.bf16.mxu1 %v1356_v12  ;;  %v1175_v11 = vld [vmem:[%s1904_s2 + $0x278] sm:$0xff] }
  0xe6   :  { %1453 = vmatprep.subr.bf16.mxu0 %v1356_v12  ;;  %v1398_v12 = vpack.c.bf16 %v1170_v8, %v1168_v6  ;;  %v1400_v13 = vpack.c.bf16 %v1175_v11, %v1173_v10 }
  0xe8   :  { %1359 = vmatpush1.bf16.msra.mxu1 %v1358_v17 }
  0xe9   :  { %1455 = vmatpush1.bf16.msra.mxu0 %v1358_v17  ;;  %1361 = vmatprep.subr.bf16.mxu1 %v1360_v18  ;;  %v1179_v17 = vld [vmem:[%s1904_s2 + $0x298] sm:$0xff] }
  0xea   :  { %1457 = vmatprep.subr.bf16.mxu0 %v1360_v18  ;;  %v1402_v18 = vpack.c.bf16 %v1174_v15, %v1172_v14  ;;  %v1404_v19 = vpack.c.bf16 %v1179_v17, %v1177_v16 }
  0xec   :  { %1363 = vmatpush1.bf16.msra.mxu1 %v1362_v23 }
  0xed   :  { %1459 = vmatpush1.bf16.msra.mxu0 %v1362_v23  ;;  %1365 = vmatprep.subr.bf16.mxu1 %v1364_v24 }
  0xee   :  { %1461 = vmatprep.subr.bf16.mxu0 %v1364_v24 }
  0xf0   :  { %1367 = vmatpush1.bf16.msra.mxu1 %v1366_v29 }
  0xf1   :  { %1463 = vmatpush1.bf16.msra.mxu0 %v1366_v29  ;;  %1369 = vmatprep.subr.bf16.mxu1 %v1368_v30 }
  0xf2   :  { %1465 = vmatprep.subr.bf16.mxu0 %v1368_v30 }
  0xf4   :  { %1371 = vmatpush1.bf16.msra.mxu1 %v1370_v35 }
  0xf5   :  { %1467 = vmatpush1.bf16.msra.mxu0 %v1370_v35  ;;  %1373 = vmatprep.subr.bf16.mxu1 %v1372_v36 }
  0xf6   :  { %1469 = vmatprep.subr.bf16.mxu0 %v1372_v36 }
  0xf8   :  { %1375 = vmatpush1.bf16.msra.mxu1 %v1374_v39 }
  0xf9   :  { %1471 = vmatpush1.bf16.msra.mxu0 %v1374_v39  ;;  %1376 = vmatprep.subr.bf16.mxu1 %v1520_v0 }
  0xfa   :  { %1472 = vmatprep.subr.bf16.mxu0 %v1520_v0  ;;  %v1157_v0 = vld [vmem:[%s1904_s2 + $0x1e8] sm:$0xff] }
  0xfb   :  { %v1384_v52 = vpack.c.bf16 %v1159_v46, %v1157_v0 }
 0x1b2   :  { %v276_v44 = vpop.f32.mrb[4].mxu1 }
 0x1b3   :  { %v821_v47 = vpop.f32.mrb[4].mxu0  ;;  %v1283_v48 = vpop.f32.mrb[5].mxu1  ;;  %1148 = vmatmul.mubr.msk.f32.vlgmr.msra.gmra.mrb[2].mxu1 %vm128_vm5, %v276_v44 }
 0x1b4   :  { %1379 = vmatpush3.bf16.msk.msra.mxu1 %vm1557_vm2, %v1561_v4  ;;  %v1304_v49 = vpop.f32.mrb[5].mxu0  ;;  %1217 = vmatmul.mubr.msk.f32.vlgmr.msra.gmra.mrb[2].mxu0 %vm128_vm5, %v821_v47  ;;  %v1156_v4 = vld [vmem:[%s1904_s2 + $0x1e0] sm:$0xff] }
 0x1b5   :  { %1475 = vmatpush3.bf16.msk.msra.mxu0 %vm1557_vm2, %v1576_v9  ;;  %1288 = vmatprep.mubr.msk.f32.mxu1 %vm1522_vm3, %v1523_v7  ;;  %v1163_v9 = vld [vmem:[%s1904_s2 + $0x218] sm:$0xff]  ;;  %v1386_v54 = vpack.c.bf16 %v1158_v53, %v1156_v4 }
 0x1b6   :  { %1309 = vmatprep.mubr.msk.f32.mxu0 %vm1522_vm3, %v1523_v7  ;;  %1381 = vmatprep.subr.bf16.mxu1 %v1380_v45  ;;  %v1388_v55 = vpack.c.bf16 %v1163_v9, %v1161_v3 }
 0x1b7   :  { %1289 = vmatmul.mubr.msk.f32.vlgmr.msra.gmra.mrb[6].mxu1 %vm22_vm4, %v1149_v50  ;;  %1477 = vmatprep.subr.bf16.mxu0 %v1380_v45 }
 0x1b8   :  { %1310 = vmatmul.mubr.msk.f32.vlgmr.msra.gmra.mrb[6].mxu0 %vm22_vm4, %v1149_v50  ;;  %1383 = vmatpush1.bf16.msra.mxu1 %v1382_v51 }
 0x1b9   :  { %1479 = vmatpush1.bf16.msra.mxu0 %v1382_v51  ;;  %1385 = vmatprep.subr.bf16.mxu1 %v1384_v52 }
 0x1ba   :  { %1481 = vmatprep.subr.bf16.mxu0 %v1384_v52  ;;  %556 = vmatprep.mubr.f32.mxu1 %v1523_v7 }
 0x1bb   :  { %1098 = vmatprep.mubr.f32.mxu0 %v1523_v7  ;;  %v1171_v7 = vld [vmem:[%s1904_s2 + $0x258] sm:$0xff] }
 0x1bc   :  { %1387 = vmatpush1.bf16.msra.mxu1 %v1386_v54  ;;  %v1396_v5 = vpack.c.bf16 %v1171_v7, %v1169_v1 }
 0x1bd   :  { %1483 = vmatpush1.bf16.msra.mxu0 %v1386_v54  ;;  %1389 = vmatprep.subr.bf16.mxu1 %v1388_v55 }
 0x1be   :  { %1485 = vmatprep.subr.bf16.mxu0 %v1388_v55 }
 0x1c0   :  { %1391 = vmatpush1.bf16.msra.mxu1 %v1390_v60 }
 0x1c1   :  { %1487 = vmatpush1.bf16.msra.mxu0 %v1390_v60  ;;  %1393 = vmatprep.subr.bf16.mxu1 %v1392_v61 }
 0x1c2   :  { %1489 = vmatprep.subr.bf16.mxu0 %v1392_v61 }
 0x1c4   :  { %1395 = vmatpush1.bf16.msra.mxu1 %v1394_v2 }
 0x1c5   :  { %1491 = vmatpush1.bf16.msra.mxu0 %v1394_v2  ;;  %1397 = vmatprep.subr.bf16.mxu1 %v1396_v5 }
 0x1c6   :  { %1493 = vmatprep.subr.bf16.mxu0 %v1396_v5 }
 0x1c8   :  { %1399 = vmatpush1.bf16.msra.mxu1 %v1398_v12 }
 0x1c9   :  { %1495 = vmatpush1.bf16.msra.mxu0 %v1398_v12  ;;  %1401 = vmatprep.subr.bf16.mxu1 %v1400_v13 }
 0x1ca   :  { %1497 = vmatprep.subr.bf16.mxu0 %v1400_v13 }
 0x1cc   :  { %1403 = vmatpush1.bf16.msra.mxu1 %v1402_v18 }
 0x1cd   :  { %1499 = vmatpush1.bf16.msra.mxu0 %v1402_v18  ;;  %1405 = vmatprep.subr.bf16.mxu1 %v1404_v19 }
 0x1ce   :  { %1501 = vmatprep.subr.bf16.mxu0 %v1404_v19 }
 0x1d0   :  { %1407 = vmatpush1.bf16.msra.mxu1 %v1406_v22 }
 0x1d1   :  { %1503 = vmatpush1.bf16.msra.mxu0 %v1406_v22 }
 0x28a   :  { %v456_v23 = vpop.f32.mrb[6].mxu1 }
 0x28b   :  { %v999_v24 = vpop.f32.mrb[6].mxu0  ;;  %v1290_v25 = vpop.f32.mrb[7].mxu1  ;;  %1180 = vmatmul.mubr.msk.f32.vlgmr.msra.gmra.mrb[2].mxu1 %vm128_vm5, %v456_v23 }
 0x28c   :  { %v1311_v26 = vpop.f32.mrb[7].mxu0  ;;  %1249 = vmatmul.mubr.msk.f32.vlgmr.msra.gmra.mrb[2].mxu0 %vm128_vm5, %v999_v24 }
 0x35e   :  { %v558_v29 = vpop.f32.mrb[2].mxu1 }
 0x35f   :  { %v1504_v30 = vadd.f32 %v558_v29, %v17_v27  ;;  %v1100_v31 = vpop.f32.mrb[2].mxu0  ;;  %v560_v32 = vpop.f32.mrb[3].mxu1 }
 0x360   :  { %v1506_v33 = vadd.f32 %v1100_v31, %v17_v27  ;;  %v1505_v34 = vadd.f32 %v560_v32, %v18_v28  ;;  %v1102_v35 = vpop.f32.mrb[3].mxu0 }
 0x361   :  { %565 = vst [vmem:[%s1906_s4] sm:$0xff] %v1504_v30  ;;  %v1507_v36 = vadd.f32 %v1102_v35, %v18_v28 }
 0x362   :  { %1250 = vst [vmem:[%s1906_s4 + $0x10] sm:$0xff] %v1506_v33  ;;  %566 = vst [vmem:[%s1906_s4 + $0x8] sm:$0xff] %v1505_v34 }
 0x363   :  { %1251 = vst [vmem:[%s1906_s4 + $0x18] sm:$0xff] %v1507_v36 }

</bundles_post_ra>
